<compile_context>
chip_gen: v7x
topology: tpu7x:2x2x1
jax: 0.10.0
libtpu: 0.0.40
codegen_flags: <defaults>
</compile_context>

<pallas_src>
import jax
import jax.numpy as jnp
from jax.experimental import pallas as pl
from jax.experimental.pallas import tpu as pltpu

HIDDEN = 64
LANE = 128
TB_HARD_CAP = 4096                      # upper bound on the batch tile
VMEM_TILE_BUDGET = 12 * 1024 * 1024     # keep tiles + f32 activation chain well under
                                        # v5e's 16 MiB default scoped VMEM


def _round_up(n, m):
    return (n + m - 1) // m * m


def _cdiv(a, b):
    return (a + b - 1) // b


def _mlp_kernel(x_ref,
                w1_ref, b1_ref,
                w2_ref, b2_ref,
                w3_ref, b3_ref,
                w4_ref, b4_ref,
                o_ref):
    # x_ref : [TB, D_in]   f32
    # wK_ref: [in_K, out_K] f32 (transposed vs PyTorch)
    # bK_ref: [1, out_K]   f32
    # o_ref : [TB, D_out]  f32
    x = x_ref[...]

    # Layer 1: Linear(D_in, 64) + ReLU — f32 operands, f32 accumulate (MXU has slack).
    h = jnp.dot(x, w1_ref[...], preferred_element_type=jnp.float32) + b1_ref[...]
    h = jnp.maximum(h, 0.0)

    # Layer 2: Linear(64, 64) + ReLU
    h = jnp.dot(h, w2_ref[...], preferred_element_type=jnp.float32) + b2_ref[...]
    h = jnp.maximum(h, 0.0)

    # Layer 3: Linear(64, 64) + ReLU
    h = jnp.dot(h, w3_ref[...], preferred_element_type=jnp.float32) + b3_ref[...]
    h = jnp.maximum(h, 0.0)

    # Layer 4: Linear(64, D_out)
    logits = jnp.dot(h, w4_ref[...], preferred_element_type=jnp.float32) + b4_ref[...]

    # Numerically stable log_softmax over the feature axis (PyTorch dim=1).
    m = jnp.max(logits, axis=-1, keepdims=True)
    shifted = logits - m
    lse = jnp.log(jnp.sum(jnp.exp(shifted), axis=-1, keepdims=True))
    o_ref[...] = shifted - lse


@jax.jit
def mlp_dumm_forward(x, params):
    """x: [B, input_dim] f32; params: dict of transposed f32 weights + [1, out] biases."""
    B, D_in = x.shape
    D_out = params["w4"].shape[1]

    # ---- batch tile selection -------------------------------------------------
    # VMEM per row: double-buffered x/out tiles + ~3 live f32 activation buffers.
    bytes_per_row = 4 * (2 * (D_in + D_out) + 3 * HIDDEN)
    tb_vmem = max(LANE, (VMEM_TILE_BUDGET // bytes_per_row) // LANE * LANE)
    tb_max = min(TB_HARD_CAP, tb_vmem)

    if B <= 2 * LANE:
        # Tiny batch: one full-dim block (legal even if B % 8 != 0), no padding, no slice.
        TB = B
        B_pad = B
    else:
        # Large batch: tile; ensure >= 2 grid steps so both v7x TensorCores get work.
        TB = min(tb_max, _round_up(_cdiv(B, 2), LANE))
        B_pad = _round_up(B, TB)

    xp = x if B_pad == B else jnp.pad(x, ((0, B_pad - B), (0, 0)))

    w1, b1 = params["w1"], params["b1"]
    w2, b2 = params["w2"], params["b2"]
    w3, b3 = params["w3"], params["b3"]
    w4, b4 = params["w4"], params["b4"]

    const2 = lambda i: (0, 0)  # weights/biases: same (grid-invariant) block every step

    flops = 2 * B_pad * (D_in * HIDDEN + 2 * HIDDEN * HIDDEN + HIDDEN * D_out)
    bytes_accessed = 4 * (B_pad * D_in + B_pad * D_out
                          + D_in * HIDDEN + 2 * HIDDEN * HIDDEN + HIDDEN * D_out
                          + 3 * HIDDEN + D_out)

    out = pl.pallas_call(
        _mlp_kernel,
        out_shape=jax.ShapeDtypeStruct((B_pad, D_out), jnp.float32),
        grid_spec=pl.GridSpec(
            grid=(B_pad // TB,),
            in_specs=[
                pl.BlockSpec((TB, D_in), lambda i: (i, 0)),
                pl.BlockSpec((D_in, HIDDEN), const2),
                pl.BlockSpec((1, HIDDEN), const2),
                pl.BlockSpec((HIDDEN, HIDDEN), const2),
                pl.BlockSpec((1, HIDDEN), const2),
                pl.BlockSpec((HIDDEN, HIDDEN), const2),
                pl.BlockSpec((1, HIDDEN), const2),
                pl.BlockSpec((HIDDEN, D_out), const2),
                pl.BlockSpec((1, D_out), const2),
            ],
            out_specs=pl.BlockSpec((TB, D_out), lambda i: (i, 0)),
        ),
        compiler_params=pltpu.CompilerParams(
            # Batch tiles are independent: shard across both v7x TensorCores;
            # near no-op on single-TC v5e/v6e.
            dimension_semantics=("parallel",),
        ),
        cost_estimate=pl.CostEstimate(
            flops=flops,
            transcendentals=B_pad * (D_out + 1),
            bytes_accessed=bytes_accessed,
        ),
    )(xp, w1, b1, w2, b2, w3, b3, w4, b4)

    return out if B_pad == B else out[:B]


def init_params(key, input_dim, output_dim):
    """Deterministic init mimicking nn.Linear default (uniform ±1/sqrt(fan_in)).

    Weights stored TRANSPOSED vs PyTorch: [in_features, out_features]; biases [1, out].
    """
    dims = [(input_dim, HIDDEN), (HIDDEN, HIDDEN), (HIDDEN, HIDDEN), (HIDDEN, output_dim)]
    params = {}
    for i, (fan_in, fan_out) in enumerate(dims, start=1):
        key, kw, kb = jax.random.split(key, 3)
        bound = 1.0 / jnp.sqrt(jnp.float32(fan_in))
        params[f"w{i}"] = jax.random.uniform(
            kw, (fan_in, fan_out), jnp.float32, minval=-bound, maxval=bound)
        params[f"b{i}"] = jax.random.uniform(
            kb, (1, fan_out), jnp.float32, minval=-bound, maxval=bound)
    return params


def reference_forward_f32(x, params):
    """Pure-JAX reference of the original module semantics (f32 throughout)."""
    hp = jax.lax.Precision.HIGHEST

    def lin(h, w, b):
        return jnp.dot(h, w, precision=hp, preferred_element_type=jnp.float32) + b

    h = jnp.maximum(lin(x, params["w1"], params["b1"]), 0.0)
    h = jnp.maximum(lin(h, params["w2"], params["b2"]), 0.0)
    h = jnp.maximum(lin(h, params["w3"], params["b3"]), 0.0)
    logits = lin(h, params["w4"], params["b4"])
    return jax.nn.log_softmax(logits, axis=1)


if __name__ == "__main__":
    input_dim = 32
    output_dim = 16
    batch = 8

    key = jax.random.PRNGKey(0)
    key, kx = jax.random.split(key)
    x = jax.random.normal(kx, (batch, input_dim), dtype=jnp.float32)

    params = init_params(key, input_dim, output_dim)

    out = mlp_dumm_forward(x, params)
    out = jax.block_until_ready(out)

    ref = reference_forward_f32(x, params)

    assert out.shape == (batch, output_dim), f"bad output shape {out.shape}"
    assert bool(jnp.all(jnp.isfinite(out))), "non-finite values in output"
    # f32 MXU operands → tight parity with the f32 PyTorch module semantics.
    assert jnp.allclose(out, ref, atol=5e-3, rtol=5e-3), "mismatch vs f32 reference"
    # log_softmax rows must normalize to 1.
    assert jnp.allclose(jnp.sum(jnp.exp(out), axis=1), 1.0, atol=1e-4), "rows not normalized"

    print("KERNEL_OK")
</pallas_src>

<mosaic_0001>
module attributes {stable_mosaic.version = 11 : i64} {
  func.func @_mlp_kernel(%arg0: i32, %arg1: memref<8x32xf32, #tpu.memory_space<vmem>>, %arg2: memref<32x64xf32, #tpu.memory_space<vmem>>, %arg3: memref<1x64xf32, #tpu.memory_space<vmem>>, %arg4: memref<64x64xf32, #tpu.memory_space<vmem>>, %arg5: memref<1x64xf32, #tpu.memory_space<vmem>>, %arg6: memref<64x64xf32, #tpu.memory_space<vmem>>, %arg7: memref<1x64xf32, #tpu.memory_space<vmem>>, %arg8: memref<64x16xf32, #tpu.memory_space<vmem>>, %arg9: memref<1x16xf32, #tpu.memory_space<vmem>>, %arg10: memref<8x16xf32, #tpu.memory_space<vmem>>) attributes {dimension_semantics = [#tpu.dimension_semantics<parallel>], iteration_bounds = array<i64: 1>, scalar_prefetch = 0 : i64, scratch_operands = 0 : i64, tpu.core_type = #tpu.core_type<tc>, window_params = [{transform_indices = @transform_0, window_bounds = array<i64: 8, 32>}, {pipeline_mode = #tpu.pipeline_mode<synchronous>, transform_indices = @transform_1, window_bounds = array<i64: 32, 64>}, {pipeline_mode = #tpu.pipeline_mode<synchronous>, transform_indices = @transform_2, window_bounds = array<i64: 1, 64>}, {pipeline_mode = #tpu.pipeline_mode<synchronous>, transform_indices = @transform_3, window_bounds = array<i64: 64, 64>}, {pipeline_mode = #tpu.pipeline_mode<synchronous>, transform_indices = @transform_4, window_bounds = array<i64: 1, 64>}, {pipeline_mode = #tpu.pipeline_mode<synchronous>, transform_indices = @transform_5, window_bounds = array<i64: 64, 64>}, {pipeline_mode = #tpu.pipeline_mode<synchronous>, transform_indices = @transform_6, window_bounds = array<i64: 1, 64>}, {pipeline_mode = #tpu.pipeline_mode<synchronous>, transform_indices = @transform_7, window_bounds = array<i64: 64, 16>}, {pipeline_mode = #tpu.pipeline_mode<synchronous>, transform_indices = @transform_8, window_bounds = array<i64: 1, 16>}, {transform_indices = @transform_9, window_bounds = array<i64: 8, 16>}]} {
    %c0 = arith.constant 0 : index
    %c0_0 = arith.constant 0 : index
    %0 = vector.load %arg1[%c0, %c0_0] : memref<8x32xf32, #tpu.memory_space<vmem>>, vector<8x32xf32>
    %c0_1 = arith.constant 0 : index
    %c0_2 = arith.constant 0 : index
    %1 = vector.load %arg2[%c0_1, %c0_2] : memref<32x64xf32, #tpu.memory_space<vmem>>, vector<32x64xf32>
    %cst = arith.constant dense<0.000000e+00> : vector<8x64xf32>
    %2 = tpu.matmul %0, %1, %cst {dimension_numbers = #tpu.dot_dimension_numbers<[1], [0], [0], [1], [0, 0, 1, 1], [], []>} : vector<8x32xf32>, vector<32x64xf32>, vector<8x64xf32> -> vector<8x64xf32>
    %c0_3 = arith.constant 0 : index
    %c0_4 = arith.constant 0 : index
    %3 = vector.load %arg3[%c0_3, %c0_4] : memref<1x64xf32, #tpu.memory_space<vmem>>, vector<1x64xf32>
    %4 = vector.broadcast %3 : vector<1x64xf32> to vector<8x64xf32>
    %5 = arith.addf %2, %4 : vector<8x64xf32>
    %cst_5 = arith.constant 0.000000e+00 : f32
    %6 = vector.broadcast %cst_5 : f32 to vector<8x64xf32>
    %7 = arith.maximumf %5, %6 : vector<8x64xf32>
    %c0_6 = arith.constant 0 : index
    %c0_7 = arith.constant 0 : index
    %8 = vector.load %arg4[%c0_6, %c0_7] : memref<64x64xf32, #tpu.memory_space<vmem>>, vector<64x64xf32>
    %cst_8 = arith.constant dense<0.000000e+00> : vector<8x64xf32>
    %9 = tpu.matmul %7, %8, %cst_8 {dimension_numbers = #tpu.dot_dimension_numbers<[1], [0], [0], [1], [0, 0, 1, 1], [], []>} : vector<8x64xf32>, vector<64x64xf32>, vector<8x64xf32> -> vector<8x64xf32>
    %c0_9 = arith.constant 0 : index
    %c0_10 = arith.constant 0 : index
    %10 = vector.load %arg5[%c0_9, %c0_10] : memref<1x64xf32, #tpu.memory_space<vmem>>, vector<1x64xf32>
    %11 = vector.broadcast %10 : vector<1x64xf32> to vector<8x64xf32>
    %12 = arith.addf %9, %11 : vector<8x64xf32>
    %cst_11 = arith.constant 0.000000e+00 : f32
    %13 = vector.broadcast %cst_11 : f32 to vector<8x64xf32>
    %14 = arith.maximumf %12, %13 : vector<8x64xf32>
    %c0_12 = arith.constant 0 : index
    %c0_13 = arith.constant 0 : index
    %15 = vector.load %arg6[%c0_12, %c0_13] : memref<64x64xf32, #tpu.memory_space<vmem>>, vector<64x64xf32>
    %cst_14 = arith.constant dense<0.000000e+00> : vector<8x64xf32>
    %16 = tpu.matmul %14, %15, %cst_14 {dimension_numbers = #tpu.dot_dimension_numbers<[1], [0], [0], [1], [0, 0, 1, 1], [], []>} : vector<8x64xf32>, vector<64x64xf32>, vector<8x64xf32> -> vector<8x64xf32>
    %c0_15 = arith.constant 0 : index
    %c0_16 = arith.constant 0 : index
    %17 = vector.load %arg7[%c0_15, %c0_16] : memref<1x64xf32, #tpu.memory_space<vmem>>, vector<1x64xf32>
    %18 = vector.broadcast %17 : vector<1x64xf32> to vector<8x64xf32>
    %19 = arith.addf %16, %18 : vector<8x64xf32>
    %cst_17 = arith.constant 0.000000e+00 : f32
    %20 = vector.broadcast %cst_17 : f32 to vector<8x64xf32>
    %21 = arith.maximumf %19, %20 : vector<8x64xf32>
    %c0_18 = arith.constant 0 : index
    %c0_19 = arith.constant 0 : index
    %22 = vector.load %arg8[%c0_18, %c0_19] : memref<64x16xf32, #tpu.memory_space<vmem>>, vector<64x16xf32>
    %cst_20 = arith.constant dense<0.000000e+00> : vector<8x16xf32>
    %23 = tpu.matmul %21, %22, %cst_20 {dimension_numbers = #tpu.dot_dimension_numbers<[1], [0], [0], [1], [0, 0, 1, 1], [], []>} : vector<8x64xf32>, vector<64x16xf32>, vector<8x16xf32> -> vector<8x16xf32>
    %c0_21 = arith.constant 0 : index
    %c0_22 = arith.constant 0 : index
    %24 = vector.load %arg9[%c0_21, %c0_22] : memref<1x16xf32, #tpu.memory_space<vmem>>, vector<1x16xf32>
    %25 = vector.broadcast %24 : vector<1x16xf32> to vector<8x16xf32>
    %26 = arith.addf %23, %25 : vector<8x16xf32>
    %cst_23 = arith.constant dense<0xFF800000> : vector<8xf32>
    %27 = vector.multi_reduction <maximumf>, %26, %cst_23 [1] : vector<8x16xf32> to vector<8xf32>
    %28 = vector.shape_cast %27 : vector<8xf32> to vector<8x1xf32>
    %29 = vector.broadcast %28 : vector<8x1xf32> to vector<8x16xf32>
    %30 = arith.subf %26, %29 : vector<8x16xf32>
    %31 = math.exp %30 : vector<8x16xf32>
    %cst_24 = arith.constant dense<0.000000e+00> : vector<8xf32>
    %32 = vector.multi_reduction <add>, %31, %cst_24 [1] : vector<8x16xf32> to vector<8xf32>
    %33 = vector.shape_cast %32 : vector<8xf32> to vector<8x1xf32>
    %34 = math.log %33 : vector<8x1xf32>
    %35 = vector.broadcast %34 : vector<8x1xf32> to vector<8x16xf32>
    %36 = arith.subf %30, %35 : vector<8x16xf32>
    %c0_25 = arith.constant 0 : index
    %c0_26 = arith.constant 0 : index
    %37 = vector.load %arg10[%c0_25, %c0_26] : memref<8x16xf32, #tpu.memory_space<vmem>>, vector<8x16xf32>
    tpu.vector_store %arg10[%c0_25, %c0_26], %36 {strides = array<i32>} : memref<8x16xf32, #tpu.memory_space<vmem>>, vector<8x16xf32>,
    return
  }
  func.func @transform_0(%arg0: i32) -> (i32, i32) {
    %c0_i32 = arith.constant 0 : i32
    %c0_i32_0 = arith.constant 0 : i32
    return %arg0, %c0_i32 : i32, i32
  }
  func.func @transform_1(%arg0: i32) -> (i32, i32) {
    %c0_i32 = arith.constant 0 : i32
    %c0_i32_0 = arith.constant 0 : i32
    %c0_i32_1 = arith.constant 0 : i32
    return %c0_i32, %c0_i32_0 : i32, i32
  }
  func.func @transform_2(%arg0: i32) -> (i32, i32) {
    %c0_i32 = arith.constant 0 : i32
    %c0_i32_0 = arith.constant 0 : i32
    %c0_i32_1 = arith.constant 0 : i32
    return %c0_i32, %c0_i32_0 : i32, i32
  }
  func.func @transform_3(%arg0: i32) -> (i32, i32) {
    %c0_i32 = arith.constant 0 : i32
    %c0_i32_0 = arith.constant 0 : i32
    %c0_i32_1 = arith.constant 0 : i32
    return %c0_i32, %c0_i32_0 : i32, i32
  }
  func.func @transform_4(%arg0: i32) -> (i32, i32) {
    %c0_i32 = arith.constant 0 : i32
    %c0_i32_0 = arith.constant 0 : i32
    %c0_i32_1 = arith.constant 0 : i32
    return %c0_i32, %c0_i32_0 : i32, i32
  }
  func.func @transform_5(%arg0: i32) -> (i32, i32) {
    %c0_i32 = arith.constant 0 : i32
    %c0_i32_0 = arith.constant 0 : i32
    %c0_i32_1 = arith.constant 0 : i32
    return %c0_i32, %c0_i32_0 : i32, i32
  }
  func.func @transform_6(%arg0: i32) -> (i32, i32) {
    %c0_i32 = arith.constant 0 : i32
    %c0_i32_0 = arith.constant 0 : i32
    %c0_i32_1 = arith.constant 0 : i32
    return %c0_i32, %c0_i32_0 : i32, i32
  }
  func.func @transform_7(%arg0: i32) -> (i32, i32) {
    %c0_i32 = arith.constant 0 : i32
    %c0_i32_0 = arith.constant 0 : i32
    %c0_i32_1 = arith.constant 0 : i32
    return %c0_i32, %c0_i32_0 : i32, i32
  }
  func.func @transform_8(%arg0: i32) -> (i32, i32) {
    %c0_i32 = arith.constant 0 : i32
    %c0_i32_0 = arith.constant 0 : i32
    %c0_i32_1 = arith.constant 0 : i32
    return %c0_i32, %c0_i32_0 : i32, i32
  }
  func.func @transform_9(%arg0: i32) -> (i32, i32) {
    %c0_i32 = arith.constant 0 : i32
    %c0_i32_0 = arith.constant 0 : i32
    return %arg0, %c0_i32 : i32, i32
  }
}

</mosaic_0001>

<bundles_post_ra>
// kernel: mlp_dumm_forward.1
= control target key start
LH: loop header
LB: loop body
LE: loop exit
PB: predicated region body
PF: predicated region fallthrough
CT: control target
= control target key end

     0   :  { %14 = vsyncpa [#allocation3], 0  ;;  %s874_s0 = inlined_call_operand.hbm [shape: f32[8,32], index: 0, kind: input, shape index: {}]   ;;  %s875_s1 = inlined_call_operand.vmem [shape: f32[32,64], index: 1, kind: input, shape index: {}]   ;;  %s876_s2 = inlined_call_operand.vmem [shape: f32[1,64], index: 2, kind: input, shape index: {}]   ;;  %s877_s3 = inlined_call_operand.vmem [shape: f32[64,64], index: 3, kind: input, shape index: {}]   ;;  %s878_s4 = inlined_call_operand.vmem [shape: f32[1,64], index: 4, kind: input, shape index: {}]   ;;  %s879_s5 = inlined_call_operand.hbm [shape: f32[64,64], index: 5, kind: input, shape index: {}]   ;;  %s880_s6 = inlined_call_operand.vmem [shape: f32[1,64], index: 6, kind: input, shape index: {}]   ;;  %s881_s7 = inlined_call_operand.vmem [shape: f32[64,16], index: 7, kind: input, shape index: {}]   ;;  %s882_s8 = inlined_call_operand.vmem [shape: f32[1,16], index: 8, kind: input, shape index: {}]   ;;  %s883_s9 = inlined_call_operand.hbm [shape: f32[8,16], index: 9, kind: output, shape index: {}]  }
   0x1   :  { %15 = vsyncpa [#allocation6], 0 }
   0x2   :  { %16 = vsyncpa [#allocation4], 0  ;;  %s677_s30 = smov [#allocation2]   ;;  %s678_s11 = smov [#allocation5]  }
   0x3   :  { %s23_s10 = sshll.u32 %s677_s30, 4  ;;  %s40_s12 = sshll.u32 %s678_s11, 4  ;;  %s24_s10 = int_to_ptr.vmem [resolvable:$true] %s23_s10  ;;  %s735_s12 = int_to_ptr.vmem [resolvable:$true] %s40_s12 }
   0x4   :  { %s605_s15 = scalar_lea.hbm %s874_s0, 128 }
   0x5   :  { %p606_p0 = scmp.ne.s32.totalorder %s874_s0, %s605_s15  ;;  %p609_p1 = scmp.lt.u32.totalorder %s605_s15, %s874_s0 }
   0x7   :  { %p611_p2 = pnand %p609_p1, %p606_p0 }
   0x9   :  { %614 = shalt.err (!%p611_p2)
}
   0xa   :  { %s615_s20 = scalar_lea.vmem %s24_s10, 128  ;;  %p620_p4 = scmp.lt.s32.totalorder %s24_s10, %s24_s10 }
   0xb   :  { %p616_p3 = scmp.ne.s32.totalorder %s24_s10, %s615_s20  ;;  %p621_p5 = scmp.lt.s32.totalorder %s615_s20, %s615_s20 }
   0xd   :  { %p622_p6 = por %p621_p5, %p620_p4 }
   0xf   :  { %p623_p7 = pnand %p622_p6, %p616_p3 }
  0x11   :  { %626 = shalt.err (!%p623_p7)
}
  0x12   :  { %26 = dma.hbm_to_vmem [thread:$0]  %s874_s0, 128, %s24_s10, [#allocation3]  }
  0x13   :  { %s627_s25 = scalar_lea.hbm %s879_s5, 1024 }
  0x14   :  { %p628_p8 = scmp.ne.s32.totalorder %s879_s5, %s627_s25  ;;  %p631_p9 = scmp.lt.u32.totalorder %s627_s25, %s879_s5 }
  0x16   :  { %p633_p10 = pnand %p631_p9, %p628_p8 }
  0x18   :  { %636 = shalt.err (!%p633_p10)
}
  0x19   :  { %s637_s30 = scalar_lea.vmem %s735_s12, 1024  ;;  %p642_p12 = scmp.lt.s32.totalorder %s735_s12, %s735_s12 }
  0x1a   :  { %p638_p11 = scmp.ne.s32.totalorder %s735_s12, %s637_s30  ;;  %p643_p13 = scmp.lt.s32.totalorder %s637_s30, %s637_s30 }
  0x1c   :  { %p644_p0 = por %p643_p13, %p642_p12 }
  0x1e   :  { %p645_p1 = pnand %p644_p0, %p638_p11 }
  0x20   :  { %648 = shalt.err (!%p645_p1)
}
  0x21   :  { %s679_s0 = smov 128   ;;  %s680_s10 = smov 8  }
  0x22   :  { %46 = dma.hbm_to_vmem [thread:$0]  %s879_s5, 1024, %s735_s12, [#allocation6], %s679_s0, %s679_s0, %s680_s10  }
  0x23   :  { %671 = dma.done.wait [#allocation3], 128  }
  0x24   :  { %672 = vsyncadd [#allocation3], 4294967168 }
  0x25   :  { %673 = dma.done.wait [#allocation6], 1024  }
  0x26   :  { %674 = vsyncadd [#allocation6], 4294966272  ;;  %v681_v0 = vmov 0.0|0.0   ;;  %vm682_vm0 = vmmov 0   ;;  %v683_v1 = vmov 0.0   ;;  %v60_v2 = vld [vmem:[%s875_s1] sm:$0xff] }
  0x27   :  { %551 = vmatprep.subr.bf16.mxu0 %v681_v0  ;;  %491 = vmatprep.mubr.msk.f32.mxu0 %vm682_vm0, %v683_v1  ;;  %v61_v3 = vld [vmem:[%s875_s1 + $0x8] sm:$0xff]  ;;  %v62_v4 = vld [vmem:[%s875_s1 + $0x10] sm:$0xff]  ;;  %v63_v6 = vld [vmem:[%s875_s1 + $0x18] sm:$0xff]  ;;  %vm71_vm1 = vcmask 261120   ;;  %vm161_vm2 = vcmask 523264   ;;  %vm413_vm3 = vcmask 130048  }
  0x28   :  { %557 = vmatprep.subr.bf16.mxu1 %v681_v0  ;;  %510 = vmatprep.mubr.msk.f32.mxu1 %vm682_vm0, %v683_v1  ;;  %v552_v5 = vpack.c.bf16 %v61_v3, %v60_v2  ;;  %v146_v7 = vld [vmem:[%s877_s3] sm:$0xff]  ;;  %v147_v8 = vld [vmem:[%s877_s3 + $0x8] sm:$0xff]  ;;  %v148_v9 = vld [vmem:[%s877_s3 + $0x10] sm:$0xff]  ;;  %v555_v11 = vpack.c.bf16 %v63_v6, %v62_v4 }
  0x29   :  { %v149_v10 = vld [vmem:[%s877_s3 + $0x18] sm:$0xff]  ;;  %v558_v12 = vpack.c.bf16 %v147_v8, %v146_v7  ;;  %v150_v14 = vld [vmem:[%s877_s3 + $0x20] sm:$0xff]  ;;  %v151_v15 = vld [vmem:[%s877_s3 + $0x28] sm:$0xff] }
  0x2a   :  { %553 = vmatpush3.bf16.msra.mxu0 %v552_v5  ;;  %v561_v13 = vpack.c.bf16 %v149_v10, %v148_v9  ;;  %v59_v16 = vld [vmem:[#allocation2] sm:$0xff]  ;;  %v564_v17 = vpack.c.bf16 %v151_v15, %v150_v14  ;;  %v152_v18 = vld [vmem:[%s877_s3 + $0x30] sm:$0xff]  ;;  %v153_v19 = vld [vmem:[%s877_s3 + $0x38] sm:$0xff] }
  0x2b   :  { %554 = vmatprep.subr.bf16.mxu0 %v681_v0  ;;  %559 = vmatpush3.bf16.msra.mxu1 %v558_v12  ;;  %v567_v20 = vpack.c.bf16 %v153_v19, %v152_v18  ;;  %v236_v21 = vld [vmem:[#allocation5] sm:$0xff]  ;;  %v237_v22 = vld [vmem:[#allocation5 + $0x8] sm:$0xff]  ;;  %v238_v23 = vld [vmem:[#allocation5 + $0x10] sm:$0xff] }
  0x2c   :  { %560 = vmatprep.subr.bf16.mxu1 %v681_v0  ;;  %v570_v24 = vpack.c.bf16 %v237_v22, %v236_v21  ;;  %v239_v25 = vld [vmem:[#allocation5 + $0x18] sm:$0xff]  ;;  %v240_v27 = vld [vmem:[#allocation5 + $0x20] sm:$0xff]  ;;  %v241_v28 = vld [vmem:[#allocation5 + $0x28] sm:$0xff] }
  0x2d   :  { %v573_v26 = vpack.c.bf16 %v239_v25, %v238_v23  ;;  %v576_v29 = vpack.c.bf16 %v241_v28, %v240_v27  ;;  %v443_v30 = vld [vmem:[%s876_s2] ss:$0 sm:$0xff]  ;;  %v242_v35 = vld [vmem:[#allocation5 + $0x30] sm:$0xff]  ;;  %v326_v39 = vld [vmem:[%s881_s7 + $0x8] sm:$0xff] }
  0x2e   :  { %556 = vmatpush3.bf16.msra.mxu0 %v555_v11  ;;  %v243_v36 = vld [vmem:[#allocation5 + $0x38] sm:$0xff]  ;;  %v327_v40 = vld [vmem:[%s881_s7 + $0x10] sm:$0xff]  ;;  %v328_v42 = vld [vmem:[%s881_s7 + $0x18] sm:$0xff] }
  0x2f   :  { %569 = vmatprep.subr.bf16.mxu0 %v681_v0  ;;  %562 = vmatpush3.bf16.msra.mxu1 %v561_v13  ;;  %v579_v37 = vpack.c.bf16 %v243_v36, %v242_v35  ;;  %v325_v38 = vld [vmem:[%s881_s7] sm:$0xff]  ;;  %v585_v43 = vpack.c.bf16 %v328_v42, %v327_v40  ;;  %v330_v45 = vld [vmem:[%s881_s7 + $0x28] sm:$0xff]  ;;  %v331_v52 = vld [vmem:[%s881_s7 + $0x30] sm:$0xff] }
  0x30   :  { %563 = vmatprep.subr.bf16.mxu1 %v681_v0  ;;  %v582_v41 = vpack.c.bf16 %v326_v39, %v325_v38  ;;  %v329_v44 = vld [vmem:[%s881_s7 + $0x20] sm:$0xff]  ;;  %v332_v53 = vld [vmem:[%s881_s7 + $0x38] sm:$0xff] }
  0x31   :  { %492 = vmatmul.mubr.msk.f32.vlgmr.msra.gmra.mrb[0].mxu0 %vm71_vm1, %v59_v16  ;;  %v588_v46 = vpack.c.bf16 %v330_v45, %v329_v44  ;;  %v445_v47 = vld [vmem:[%s878_s4] ss:$0 sm:$0xff]  ;;  %v591_v54 = vpack.c.bf16 %v332_v53, %v331_v52 }
  0x32   :  { %529 = vmatprep.mubr.msk.f32.mxu0 %vm682_vm0, %v683_v1  ;;  %571 = vmatpush3.bf16.msra.mxu0 %v570_v24  ;;  %v447_v55 = vld [vmem:[%s880_s6] ss:$0 sm:$0xff]  ;;  %s684_s6 = smov [#allocation7]  }
  0x33   :  { %565 = vmatpush3.bf16.msra.mxu1 %v564_v17  ;;  %572 = vmatprep.subr.bf16.mxu0 %v681_v0  ;;  %v449_v60 = vld [vmem:[%s882_s8] ss:$0 sm:$0xff]  ;;  %s433_s7 = sshll.u32 %s684_s6, 4  ;;  %s434_s7 = int_to_ptr.vmem [resolvable:$true] %s433_s7 }
  0x34   :  { %566 = vmatprep.subr.bf16.mxu1 %v681_v0  ;;  %s649_s8 = scalar_lea.vmem %s434_s7, 128  ;;  %p654_p3 = scmp.lt.s32.totalorder %s434_s7, %s434_s7 }
  0x35   :  { %p650_p2 = scmp.ne.s32.totalorder %s434_s7, %s649_s8  ;;  %p655_p4 = scmp.lt.s32.totalorder %s649_s8, %s649_s8 }
  0x36   :  { %574 = vmatpush3.bf16.msra.mxu0 %v573_v26 }
  0x37   :  { %568 = vmatpush3.bf16.msra.mxu1 %v567_v20  ;;  %575 = vmatprep.subr.bf16.mxu0 %v681_v0  ;;  %p656_p5 = por %p655_p4, %p654_p3 }
  0x38   :  { %581 = vmatprep.subr.bf16.mxu1 %v681_v0 }
  0x39   :  { %p657_p6 = pnand %p656_p5, %p650_p2 }
  0x3a   :  { %577 = vmatpush3.bf16.msra.mxu0 %v576_v29 }
  0x3b   :  { %578 = vmatprep.subr.bf16.mxu0 %v681_v0 }
  0x3e   :  { %580 = vmatpush3.bf16.msra.mxu0 %v579_v37 }
 0x104   :  { %v141_v31 = vpop.f32.mrb[0].mxu0 }
 0x105   :  { %v142_v32 = vadd.f32 %v443_v30, %v141_v31  ;;  %v493_v33 = vpop.f32.mrb[1].mxu0 }
 0x107   :  { %v145_v34 = vmax.f32 %v142_v32, 0.0 }
 0x109   :  { %511 = vmatmul.mubr.msk.f32.vlgmr.msra.gmra.mrb[0].mxu1 %vm161_vm2, %v145_v34 }
 0x10a   :  { %548 = vmatprep.mubr.msk.f32.mxu1 %vm682_vm0, %v683_v1  ;;  %583 = vmatpush3.bf16.msra.mxu1 %v582_v41 }
 0x10b   :  { %584 = vmatprep.subr.bf16.mxu1 %v681_v0 }
 0x10e   :  { %586 = vmatpush3.bf16.msra.mxu1 %v585_v43 }
 0x10f   :  { %587 = vmatprep.subr.bf16.mxu1 %v681_v0 }
 0x112   :  { %589 = vmatpush3.bf16.msra.mxu1 %v588_v46 }
 0x113   :  { %590 = vmatprep.subr.bf16.mxu1 %v681_v0 }
 0x116   :  { %592 = vmatpush3.bf16.msra.mxu1 %v591_v54 }
 0x1dc   :  { %v231_v48 = vpop.f32.mrb[0].mxu1 }
 0x1dd   :  { %v232_v49 = vadd.f32 %v445_v47, %v231_v48  ;;  %v512_v50 = vpop.f32.mrb[1].mxu1 }
 0x1df   :  { %v235_v51 = vmax.f32 %v232_v49, 0.0 }
 0x1e1   :  { %530 = vmatmul.mubr.msk.f32.vlgmr.msra.gmra.mrb[2].mxu0 %vm161_vm2, %v235_v51 }
 0x2b4   :  { %v320_v56 = vpop.f32.mrb[2].mxu0 }
 0x2b5   :  { %v321_v57 = vadd.f32 %v447_v55, %v320_v56  ;;  %v531_v58 = vpop.f32.mrb[3].mxu0 }
 0x2b7   :  { %v324_v59 = vmax.f32 %v321_v57, 0.0 }
 0x2b9   :  { %549 = vmatmul.mubr.msk.f32.vlgmr.msra.gmra.mrb[2].mxu1 %vm161_vm2, %v324_v59 }
 0x38c   :  { %v409_v61 = vpop.f32.mrb[2].mxu1 }
 0x38d   :  { %v410_v62 = vadd.f32 %v449_v60, %v409_v61  ;;  %v550_v63 = vpop.f32.mrb[3].mxu1 }
 0x38f   :  { %v414_v0 = vsel %vm413_vm3, %v410_v62, -inf }
 0x390   :  { %415 = vmax.xlane.f32.xlu0 %v414_v0 }
 0x41d   :  { %v416_v1 = vpop.xlane.xlu0 %415 }
 0x41e   :  { %v417_v2 = vsub.f32 %v410_v62, %v416_v1 }
 0x420   :  { %v418_v3 = vmul.f32 1.442695, %v417_v2 }
 0x422   :  { %601 = vpow2.f32 %v418_v3 }
 0x42c   :  { %v602_v4 = vpop.eup %601 }
 0x42d   :  { %v420_v5 = vsel %vm413_vm3, %v602_v4, 0.0 }
 0x42e   :  { %421 = vadd.xlane.f32.xlu0 %v420_v5 }
 0x4bb   :  { %v422_v6 = vpop.xlane.xlu0 %421 }
 0x4bc   :  { %603 = vlog2.f32 %v422_v6 }
 0x4c6   :  { %v604_v7 = vpop.eup %603 }
 0x4c7   :  { %v424_v8 = vmul.f32 0.6931472, %v604_v7 }
 0x4c9   :  { %v425_v9 = vsub.f32 %v417_v2, %v424_v8 }
 0x4cb   :  { %426 = vst.msk [vmem:[#allocation7] sm:$0xff] %vm413_vm3, %v425_v9 }
 0x4cc   :  { %660 = shalt.err (!%p657_p6)
}
 0x4cd   :  { %s661_s13 = scalar_lea.hbm %s883_s9, 128 }
 0x4ce   :  { %p662_p7 = scmp.ne.s32.totalorder %s883_s9, %s661_s13  ;;  %p665_p8 = scmp.lt.u32.totalorder %s661_s13, %s883_s9 }
 0x4d0   :  { %p667_p9 = pnand %p665_p8, %p662_p7 }
 0x4d2   :  { %670 = shalt.err (!%p667_p9)
}
 0x4d3   :  { %436 = dma.vmem_to_hbm [thread:$0]  %s434_s7, 128, %s883_s9, [#allocation4]  }
 0x4d4   :  { %675 = dma.done.wait [#allocation4], 128  }
 0x4d5   :  { %676 = vsyncadd [#allocation4], 4294967168 }
 0x4d6   :  { %440 = vsyncpa [#allocation3], 1 }
 0x4d7   :  { %441 = vsyncpa [#allocation6], 1 }
 0x4d8   :  { %442 = vsyncpa [#allocation4], 1 }

</bundles_post_ra>
